<compile_context>
chip_gen: v6e
topology: v6e:2x2x1
jax: 0.10.0
libtpu: 0.0.40
codegen_flags: <defaults>
</compile_context>

<pallas_src>
import jax
import jax.numpy as jnp
from jax.experimental import pallas as pl
from jax.experimental.pallas import tpu as pltpu

_SUBLANE = 32                 # multiple of 32 rows: dense for f32(8)/bf16(16)/int8(32)
_VMEM_LIMIT = 32 << 20        # scoped VMEM limit; >= 2x the max per-step footprint
_PER_STEP_BYTES = 12 << 20    # cap: ~4 MiB per operand per grid step (v7x-safe)
_TINY_ELEMS = 1024            # below this, plain XLA fusion beats a kernel launch


def _mul_kernel(a_ref, b_ref, o_ref):
    # Elementwise VPU multiply on the current VMEM tile; cast in-kernel.
    o_ref[...] = a_ref[...].astype(o_ref.dtype) * b_ref[...].astype(o_ref.dtype)


def _mul_scalar_kernel(x_ref, s_ref, o_ref):
    # Tensor * scalar: scalar lives in a resident (1, 1) tile, broadcast in-kernel.
    s = s_ref[0, 0].astype(o_ref.dtype)
    o_ref[...] = x_ref[...].astype(o_ref.dtype) * s


def _round_up(x: int, m: int) -> int:
    return ((x + m - 1) // m) * m


def _vmem_budget_bytes() -> int:
    cap = 64 << 20  # conservative default (v7x per-TensorCore VMEM)
    try:
        cap = int(getattr(pltpu.get_tpu_info(), "vmem_capacity_bytes", cap))
    except Exception:
        pass
    return cap // 2  # leave headroom for compiler scratch


def _pick_width(n: int):
    """Pick a lane-dense slab width C (multiple of 128). Prefer an exact divisor
    of n (zero-copy reshape); otherwise pad the flat tail up to a multiple."""
    for c in (8192, 4096, 2048, 1024, 512, 256, 128):
        if n % c == 0:
            return c, 0
    c = 1024
    return c, (-n) % c


def _tile_rows(r: int, c: int, dtypes):
    """Row-tile size + grid: multi-MiB tiles, multiple of 32 rows, cdiv grid."""
    bytes_per_row = sum(c * jnp.dtype(d).itemsize for d in dtypes)
    per_step = min(_vmem_budget_bytes() // 2, _PER_STEP_BYTES)  # /2: double buffering
    tr = max(_SUBLANE, (per_step // bytes_per_row) // _SUBLANE * _SUBLANE)
    # Keep a few grid steps on big arrays so DMA/compute overlap kicks in.
    if r > 4 * _SUBLANE:
        tr = min(tr, max(_SUBLANE, _round_up(pl.cdiv(r, 4), _SUBLANE)))
    if tr >= r:
        # Block equals the full row extent -> always a legal block shape.
        return r, 1
    return tr, pl.cdiv(r, tr)


def _to_slab(x: jax.Array, n: int, c: int, pad: int):
    x1 = x.reshape(-1)
    if pad:
        x1 = jnp.pad(x1, (0, pad))
    return x1.reshape((n + pad) // c, c)


def _from_slab(out2: jax.Array, n: int, pad: int, out_shape):
    out1 = out2.reshape(-1)
    if pad:
        out1 = out1[:n]
    return out1.reshape(out_shape)


def _compiler_params():
    return pltpu.CompilerParams(
        dimension_semantics=("parallel",),
        vmem_limit_bytes=_VMEM_LIMIT,
    )


def _mul_same_shape(a, b, out_shape, out_dtype):
    n = int(a.size)
    c, pad = _pick_width(n)
    a2 = _to_slab(a, n, c, pad)
    b2 = _to_slab(b, n, c, pad)
    r = (n + pad) // c
    tr, grid = _tile_rows(r, c, (a2.dtype, b2.dtype, out_dtype))

    out2 = pl.pallas_call(
        _mul_kernel,
        out_shape=jax.ShapeDtypeStruct((r, c), out_dtype),
        grid_spec=pltpu.PrefetchScalarGridSpec(
            num_scalar_prefetch=0,
            grid=(grid,),
            in_specs=[
                pl.BlockSpec((tr, c), lambda i: (i, 0)),
                pl.BlockSpec((tr, c), lambda i: (i, 0)),
            ],
            out_specs=pl.BlockSpec((tr, c), lambda i: (i, 0)),
        ),
        compiler_params=_compiler_params(),
    )(a2, b2)
    return _from_slab(out2, n, pad, out_shape)


def _mul_tensor_scalar(x, s, out_shape, out_dtype):
    # Scalar operand: never materialize its broadcast — ship it as a (1, 1) tile.
    if x.shape != out_shape:
        x = jnp.broadcast_to(x, out_shape)
    n = int(x.size)
    c, pad = _pick_width(n)
    x2 = _to_slab(x, n, c, pad)
    s2 = jnp.asarray(s).reshape(1, 1)
    r = (n + pad) // c
    tr, grid = _tile_rows(r, c, (x2.dtype, out_dtype))

    out2 = pl.pallas_call(
        _mul_scalar_kernel,
        out_shape=jax.ShapeDtypeStruct((r, c), out_dtype),
        grid_spec=pltpu.PrefetchScalarGridSpec(
            num_scalar_prefetch=0,
            grid=(grid,),
            in_specs=[
                pl.BlockSpec((tr, c), lambda i: (i, 0)),
                pl.BlockSpec((1, 1), lambda i: (0, 0)),  # full-extent (1,1) block
            ],
            out_specs=pl.BlockSpec((tr, c), lambda i: (i, 0)),
        ),
        compiler_params=_compiler_params(),
    )(x2, s2)
    return _from_slab(out2, n, pad, out_shape)


def pallas_mul(a: jax.Array, b: jax.Array) -> jax.Array:
    """Elementwise a * b with PyTorch-style broadcasting and type promotion."""
    a = jnp.asarray(a)
    b = jnp.asarray(b)
    out_shape = jnp.broadcast_shapes(a.shape, b.shape)
    out_dtype = jnp.result_type(a.dtype, b.dtype)

    n = 1
    for d in out_shape:
        n *= int(d)

    # Tiny inputs: launch + DMA setup dwarfs the multiply; let XLA fuse it.
    if n < _TINY_ELEMS:
        return (a * b).astype(out_dtype)

    a_scalar = a.size == 1
    b_scalar = b.size == 1
    if a_scalar and not b_scalar:
        return _mul_tensor_scalar(b, a, out_shape, out_dtype)
    if b_scalar and not a_scalar:
        return _mul_tensor_scalar(a, b, out_shape, out_dtype)

    # General broadcast (neither operand scalar, shapes differ): materialize the
    # shape broadcast once (no dtype cast — that happens in-kernel).
    if a.shape != out_shape:
        a = jnp.broadcast_to(a, out_shape)
    if b.shape != out_shape:
        b = jnp.broadcast_to(b, out_shape)
    return _mul_same_shape(a, b, out_shape, out_dtype)


if __name__ == "__main__":
    key = jax.random.PRNGKey(0)
    ka, kb, kc = jax.random.split(key, 3)

    # Small NCHW-style shapes consistent with typical usage of Mul.
    a = jax.random.normal(ka, (2, 4, 16, 16), dtype=jnp.float32)
    b = jax.random.normal(kb, (2, 4, 16, 16), dtype=jnp.float32)

    out = jax.block_until_ready(pallas_mul(a, b))
    ref = a * b
    assert out.shape == ref.shape and out.dtype == ref.dtype
    assert jnp.allclose(out, ref, atol=1e-6, rtol=1e-6)

    # Scalar-broadcast case exercises the no-materialized-broadcast path.
    s = jax.random.normal(kc, (), dtype=jnp.float32)
    out_s = jax.block_until_ready(pallas_mul(a, s))
    assert jnp.allclose(out_s, a * s, atol=1e-6, rtol=1e-6)

    # Channel-broadcast case exercises the general broadcast path.
    c = jax.random.normal(kc, (1, 4, 1, 1), dtype=jnp.float32)
    out_c = jax.block_until_ready(pallas_mul(a, c))
    assert jnp.allclose(out_c, a * c, atol=1e-6, rtol=1e-6)

    print("KERNEL_OK")
</pallas_src>

<mosaic_0001>
module attributes {stable_mosaic.version = 11 : i64} {
  func.func @_mul_kernel(%arg0: i32, %arg1: memref<1x2048xf32, #tpu.memory_space<vmem>>, %arg2: memref<1x2048xf32, #tpu.memory_space<vmem>>, %arg3: memref<1x2048xf32, #tpu.memory_space<vmem>>) attributes {dimension_semantics = [#tpu.dimension_semantics<parallel>], iteration_bounds = array<i64: 1>, scalar_prefetch = 0 : i64, scratch_operands = 0 : i64, tpu.core_type = #tpu.core_type<tc>, window_params = [{transform_indices = @transform_0, window_bounds = array<i64: 1, 2048>}, {transform_indices = @transform_1, window_bounds = array<i64: 1, 2048>}, {transform_indices = @transform_2, window_bounds = array<i64: 1, 2048>}]} {
    %c0 = arith.constant 0 : index
    %c0_0 = arith.constant 0 : index
    %0 = vector.load %arg1[%c0, %c0_0] : memref<1x2048xf32, #tpu.memory_space<vmem>>, vector<1x2048xf32>
    %c0_1 = arith.constant 0 : index
    %c0_2 = arith.constant 0 : index
    %1 = vector.load %arg2[%c0_1, %c0_2] : memref<1x2048xf32, #tpu.memory_space<vmem>>, vector<1x2048xf32>
    %2 = arith.mulf %0, %1 : vector<1x2048xf32>
    %c0_3 = arith.constant 0 : index
    %c0_4 = arith.constant 0 : index
    %3 = vector.load %arg3[%c0_3, %c0_4] : memref<1x2048xf32, #tpu.memory_space<vmem>>, vector<1x2048xf32>
    tpu.vector_store %arg3[%c0_3, %c0_4], %2 {strides = array<i32>} : memref<1x2048xf32, #tpu.memory_space<vmem>>, vector<1x2048xf32>,
    return
  }
  func.func @transform_0(%arg0: i32) -> (i32, i32) {
    %c0_i32 = arith.constant 0 : i32
    %c0_i32_0 = arith.constant 0 : i32
    return %arg0, %c0_i32 : i32, i32
  }
  func.func @transform_1(%arg0: i32) -> (i32, i32) {
    %c0_i32 = arith.constant 0 : i32
    %c0_i32_0 = arith.constant 0 : i32
    return %arg0, %c0_i32 : i32, i32
  }
  func.func @transform_2(%arg0: i32) -> (i32, i32) {
    %c0_i32 = arith.constant 0 : i32
    %c0_i32_0 = arith.constant 0 : i32
    return %arg0, %c0_i32 : i32, i32
  }
}

</mosaic_0001>

<bundles_post_ra>
// kernel: tpu_custom_call.1
= control target key start
LH: loop header
LB: loop body
LE: loop exit
PB: predicated region body
PF: predicated region fallthrough
CT: control target
= control target key end

     0   :  { %7 = vsyncpa [#allocation3], 0  ;;  %s156_s0 = inlined_call_operand.hbm [shape: f32[1,2048], index: 0, kind: input, shape index: {}]   ;;  %s157_s1 = inlined_call_operand.hbm [shape: f32[1,2048], index: 1, kind: input, shape index: {}]   ;;  %s158_s2 = inlined_call_operand.hbm [shape: f32[1,2048], index: 2, kind: output, shape index: {}]  }
   0x1   :  { %8 = vsyncpa [#allocation6], 0 }
   0x2   :  { %9 = vsyncpa [#allocation4], 0  ;;  %s129_s9 = smov [#allocation2]   ;;  %s130_s11 = smov [#allocation5]  }
   0x3   :  { %s16_s10 = sshll.u32 %s129_s9, 4  ;;  %s26_s12 = sshll.u32 %s130_s11, 4  ;;  %s17_s10 = int_to_ptr.vmem [resolvable:$true] %s16_s10  ;;  %s27_s12 = int_to_ptr.vmem [resolvable:$true] %s26_s12 }
   0x4   :  { %s71_s13 = scalar_lea.vmem %s17_s10, 256  ;;  %p76_p1 = scmp.lt.s32.totalorder %s17_s10, %s17_s10 }
   0x5   :  { %p72_p0 = scmp.ne.s32.totalorder %s17_s10, %s71_s13  ;;  %p77_p2 = scmp.lt.s32.totalorder %s71_s13, %s71_s13 }
   0x7   :  { %p78_p3 = por %p77_p2, %p76_p1 }
   0x9   :  { %p79_p4 = pnand %p78_p3, %p72_p0 }
   0xb   :  { %82 = shalt.err (!%p79_p4)
}
   0xc   :  { %19 = dma.hbm_to_vmem [thread:$0]  %s156_s0, 256, %s17_s10, [#allocation3]  }
   0xd   :  { %s91_s16 = scalar_lea.vmem %s27_s12, 256  ;;  %p96_p6 = scmp.lt.s32.totalorder %s27_s12, %s27_s12 }
   0xe   :  { %p92_p5 = scmp.ne.s32.totalorder %s27_s12, %s91_s16  ;;  %p97_p7 = scmp.lt.s32.totalorder %s91_s16, %s91_s16 }
  0x10   :  { %p98_p8 = por %p97_p7, %p96_p6 }
  0x12   :  { %p99_p9 = pnand %p98_p8, %p92_p5 }
  0x14   :  { %102 = shalt.err (!%p99_p9)
}
  0x15   :  { %29 = dma.hbm_to_vmem [thread:$0]  %s157_s1, 256, %s27_s12, [#allocation6]  }
  0x16   :  { %123 = dma.done.wait [#allocation3], 256  }
  0x17   :  { %124 = vsyncadd [#allocation3], 4294967040 }
  0x18   :  { %125 = dma.done.wait [#allocation6], 256  }
  0x19   :  { %126 = vsyncadd [#allocation6], 4294967040  ;;  %s131_s19 = smov [#allocation7]   ;;  %v36_v0 = vld [vmem:[#allocation2] sm:$0xff]  ;;  %v38_v1 = vld [vmem:[#allocation5] sm:$0xff] }
  0x1a   :  { %s50_s20 = sshll.u32 %s131_s19, 4  ;;  %v37_v2 = vld [vmem:[#allocation2 + $0x8] sm:$0xff]  ;;  %v40_v3 = vmul.f32 %v38_v1, %v36_v0  ;;  %v39_v4 = vld [vmem:[#allocation5 + $0x8] sm:$0xff]  ;;  %s51_s20 = int_to_ptr.vmem [resolvable:$true] %s50_s20 }
  0x1b   :  { %v41_v5 = vmul.f32 %v39_v4, %v37_v2  ;;  %s103_s0 = scalar_lea.vmem %s51_s20, 256  ;;  %p108_p11 = scmp.lt.s32.totalorder %s51_s20, %s51_s20 }
  0x1c   :  { %42 = vst [vmem:[#allocation7] sm:$0xff] %v40_v3  ;;  %p104_p10 = scmp.ne.s32.totalorder %s51_s20, %s103_s0  ;;  %p109_p12 = scmp.lt.s32.totalorder %s103_s0, %s103_s0 }
  0x1d   :  { %43 = vst [vmem:[#allocation7 + $0x8] sm:$0xff] %v41_v5 }
  0x1e   :  { %p110_p13 = por %p109_p12, %p108_p11 }
  0x20   :  { %p111_p0 = pnand %p110_p13, %p104_p10 }
  0x22   :  { %114 = shalt.err (!%p111_p0)
}
  0x23   :  { %53 = dma.vmem_to_hbm [thread:$0]  %s51_s20, 256, %s158_s2, [#allocation4]  }
  0x24   :  { %127 = dma.done.wait [#allocation4], 256  }
  0x25   :  { %128 = vsyncadd [#allocation4], 4294967040 }
  0x26   :  { %57 = vsyncpa [#allocation3], 1 }
  0x27   :  { %58 = vsyncpa [#allocation6], 1 }
  0x28   :  { %59 = vsyncpa [#allocation4], 1 }

</bundles_post_ra>
